<compile_context>
chip_gen: v6e
topology: v6e:2x2x1
jax: 0.10.0
libtpu: 0.0.40
codegen_flags: <defaults>
</compile_context>

<pallas_src>
import functools

import jax
import jax.numpy as jnp
from jax.experimental import pallas as pl
from jax.experimental.pallas import tpu as pltpu


def _rep_pad_kernel(x_ref, o_ref, *, pad: int):
    # x_ref: (TILE_R, L)   o_ref: (TILE_R, L + pad)
    x = x_ref[...]                                   # one full-tile load
    last = x[:, -1:]                                 # (TILE_R, 1)
    padded = jnp.concatenate(
        [x, jnp.broadcast_to(last, (x.shape[0], pad))], axis=-1
    )
    o_ref[...] = padded                              # one full-tile store


def _sublane_for(dtype) -> int:
    itemsize = jnp.dtype(dtype).itemsize
    return {4: 8, 2: 16, 1: 32}.get(itemsize, 8)


def replication_pad1d(x: jax.Array, padding) -> jax.Array:
    """Right-replicate-pad the last axis of x: [B, C, L] -> [B, C, L + padding[-1]].

    Matches the TimeLLM ReplicationPad1d module (only padding[-1] is used)."""
    pad = int(padding[-1])
    B, C, L = x.shape
    if pad == 0:                                     # avoid zero-width lowering edge case
        return x

    rows = B * C
    out_L = L + pad
    dtype = x.dtype
    itemsize = jnp.dtype(dtype).itemsize
    sub = _sublane_for(dtype)

    x2 = x.reshape(rows, L)

    # Row-tile sizing: keep (input + output) tile around <= 4 MiB so that
    # double-buffering of both stays well under the v7x scoped-VMEM budget,
    # while still being hundreds of KB+ for real TimeLLM shapes (amortizes the
    # ~0.35 us per-grid-step overhead and keeps DMAs large).
    bytes_per_row = (L + out_L) * itemsize
    target_rows = max(sub, (4 * 1024 * 1024) // max(bytes_per_row, 1))
    target_rows -= target_rows % sub
    target_rows = max(target_rows, sub)

    if rows > target_rows:
        tile_r = target_rows                         # multiple of sublane size
    else:
        # Everything fits in one tile. If there are enough rows, split into
        # two row-blocks so both v7x TensorCores get work (harmless elsewhere).
        half = (rows + 1) // 2
        half = ((half + sub - 1) // sub) * sub
        if half >= sub and half < rows:
            tile_r = half                            # multiple of sublane size
        else:
            tile_r = rows                            # full extent (always legal)

    grid = (pl.cdiv(rows, tile_r),)

    out2 = pl.pallas_call(
        functools.partial(_rep_pad_kernel, pad=pad),
        out_shape=jax.ShapeDtypeStruct((rows, out_L), dtype),
        grid=grid,
        in_specs=[pl.BlockSpec((tile_r, L), lambda r: (r, 0))],
        out_specs=pl.BlockSpec((tile_r, out_L), lambda r: (r, 0)),
        compiler_params=pltpu.CompilerParams(
            dimension_semantics=("parallel",),
            vmem_limit_bytes=64 * 1024 * 1024,
        ),
    )(x2)

    return out2.reshape(B, C, out_L)


def _reference(x: jax.Array, padding) -> jax.Array:
    pad = int(padding[-1])
    if pad == 0:
        return x
    rep = jnp.repeat(x[:, :, -1:], pad, axis=-1)
    return jnp.concatenate([x, rep], axis=-1)


if __name__ == "__main__":
    key = jax.random.PRNGKey(0)
    B, C, L = 2, 4, 16
    padding = (0, 8)  # PyTorch-style (left, right); module uses padding[-1]

    x = jax.random.normal(key, (B, C, L), dtype=jnp.float32)

    out = replication_pad1d(x, padding)
    out = jax.block_until_ready(out)

    ref = _reference(x, padding)
    assert out.shape == (B, C, L + padding[-1]), out.shape
    assert jnp.allclose(out, ref), "mismatch vs reference"

    print("KERNEL_OK")
</pallas_src>

<mosaic_0001>
module attributes {stable_mosaic.version = 11 : i64} {
  func.func @_rep_pad_kernel(%arg0: i32, %arg1: memref<8x16xf32, #tpu.memory_space<vmem>>, %arg2: memref<8x24xf32, #tpu.memory_space<vmem>>) attributes {dimension_semantics = [#tpu.dimension_semantics<parallel>], iteration_bounds = array<i64: 1>, scalar_prefetch = 0 : i64, scratch_operands = 0 : i64, tpu.core_type = #tpu.core_type<tc>, window_params = [{transform_indices = @transform_0, window_bounds = array<i64: 8, 16>}, {transform_indices = @transform_1, window_bounds = array<i64: 8, 24>}]} {
    %c0 = arith.constant 0 : index
    %c0_0 = arith.constant 0 : index
    %0 = vector.load %arg1[%c0, %c0_0] : memref<8x16xf32, #tpu.memory_space<vmem>>, vector<8x16xf32>
    %1 = vector.extract_strided_slice %0 {offsets = [0, 15], sizes = [8, 1], strides = [1, 1]} : vector<8x16xf32> to vector<8x1xf32>
    %2 = vector.shape_cast %1 : vector<8x1xf32> to vector<8x1xf32>
    %3 = vector.broadcast %2 : vector<8x1xf32> to vector<8x8xf32>
    %4 = tpu.concatenate %0, %3 in 1 : vector<8x16xf32>, vector<8x8xf32> -> vector<8x24xf32>
    %c0_1 = arith.constant 0 : index
    %c0_2 = arith.constant 0 : index
    %5 = vector.load %arg2[%c0_1, %c0_2] : memref<8x24xf32, #tpu.memory_space<vmem>>, vector<8x24xf32>
    tpu.vector_store %arg2[%c0_1, %c0_2], %4 {strides = array<i32>} : memref<8x24xf32, #tpu.memory_space<vmem>>, vector<8x24xf32>,
    return
  }
  func.func @transform_0(%arg0: i32) -> (i32, i32) {
    %c0_i32 = arith.constant 0 : i32
    %c0_i32_0 = arith.constant 0 : i32
    return %arg0, %c0_i32 : i32, i32
  }
  func.func @transform_1(%arg0: i32) -> (i32, i32) {
    %c0_i32 = arith.constant 0 : i32
    %c0_i32_0 = arith.constant 0 : i32
    return %arg0, %c0_i32 : i32, i32
  }
}

</mosaic_0001>

<bundles_post_ra>
// kernel: tpu_custom_call.1
= control target key start
LH: loop header
LB: loop body
LE: loop exit
PB: predicated region body
PF: predicated region fallthrough
CT: control target
= control target key end

     0   :  { %6 = vsyncpa [#allocation3], 0  ;;  %s113_s0 = inlined_call_operand.hbm [shape: f32[8,16], index: 0, kind: input, shape index: {}]   ;;  %s114_s1 = inlined_call_operand.hbm [shape: f32[8,24], index: 1, kind: output, shape index: {}]  }
   0x1   :  { %7 = vsyncpa [#allocation4], 0  ;;  %s94_s6 = smov [#allocation2]  }
   0x2   :  { %s14_s7 = sshll.u32 %s94_s6, 4  ;;  %s15_s7 = int_to_ptr.vmem [resolvable:$true] %s14_s7 }
   0x3   :  { %s58_s8 = scalar_lea.vmem %s15_s7, 128  ;;  %p63_p1 = scmp.lt.s32.totalorder %s15_s7, %s15_s7 }
   0x4   :  { %p59_p0 = scmp.ne.s32.totalorder %s15_s7, %s58_s8  ;;  %p64_p2 = scmp.lt.s32.totalorder %s58_s8, %s58_s8 }
   0x6   :  { %p65_p3 = por %p64_p2, %p63_p1 }
   0x8   :  { %p66_p4 = pnand %p65_p3, %p59_p0 }
   0xa   :  { %69 = shalt.err (!%p66_p4)
}
   0xb   :  { %17 = dma.hbm_to_vmem [thread:$0]  %s113_s0, 128, %s15_s7, [#allocation3]  }
   0xc   :  { %90 = dma.done.wait [#allocation3], 128  }
   0xd   :  { %91 = vsyncadd [#allocation3], 4294967168  ;;  %v95_v0 = vmov 15   ;;  %v21_v1 = vld [vmem:[#allocation2] sm:$0xff]  ;;  %s96_s11 = smov [#allocation5]   ;;  %vm27_vm0 = vcmask 130048  }
   0xe   :  { %49 = vset.pattern.permute.xlu0 %v95_v0  ;;  %s37_s12 = sshll.u32 %s96_s11, 4  ;;  %vm29_vm1 = vcmask 195584   ;;  %s38_s12 = int_to_ptr.vmem [resolvable:$true] %s37_s12 }
   0xf   :  { %24 = vperm.xlu0 %49, %v21_v1   ;;  %s70_s13 = scalar_lea.vmem %s38_s12, 128  ;;  %p75_p6 = scmp.lt.s32.totalorder %s38_s12, %s38_s12 }
  0x10   :  { %p71_p5 = scmp.ne.s32.totalorder %s38_s12, %s70_s13  ;;  %p76_p7 = scmp.lt.s32.totalorder %s70_s13, %s70_s13 }
  0x12   :  { %p77_p8 = por %p76_p7, %p75_p6 }
  0x14   :  { %p78_p9 = pnand %p77_p8, %p71_p5 }
  0x8a   :  { %v25_v2 = vpop.permute.xlu0 %24 }
  0x8b   :  { %v28_v3 = vsel %vm27_vm0, %v21_v1, %v25_v2 }
  0x8c   :  { %30 = vst.msk [vmem:[#allocation5] sm:$0xff] %vm29_vm1, %v28_v3 }
  0x8d   :  { %81 = shalt.err (!%p78_p9)
}
  0x8e   :  { %40 = dma.vmem_to_hbm [thread:$0]  %s38_s12, 128, %s114_s1, [#allocation4]  }
  0x8f   :  { %92 = dma.done.wait [#allocation4], 128  }
  0x90   :  { %93 = vsyncadd [#allocation4], 4294967168 }
  0x91   :  { %44 = vsyncpa [#allocation3], 1 }
  0x92   :  { %45 = vsyncpa [#allocation4], 1 }

</bundles_post_ra>
